<compile_context>
chip_gen: v7x
topology: tpu7x:2x2x1
jax: 0.10.0
libtpu: 0.0.40
codegen_flags: <defaults>
</compile_context>

<pallas_src>
import functools

import jax
import jax.numpy as jnp
from jax.experimental import pallas as pl
from jax.experimental.pallas import tpu as pltpu


def _pos_enc_kernel(off_ref,                            # SMEM (B,) int32 row offsets (clamped lens_lang)
                    lang_ref, frames_ref, actions_ref,  # VMEM full arrays (B, T_*, D)
                    emb_ref,                            # VMEM (max_pos, D) embedding table
                    lang_o, frames_o, actions_o,        # VMEM outputs
                    *, batch, t_lang, t_frames, t_actions, t_max):
    # ---- lang: positions 0..T_lang-1, identical for every batch row ----------
    lang_win = emb_ref[:t_lang, :]                       # static sublane slice
    lang_o[...] = (lang_ref[...] + lang_win[None, :, :]).astype(lang_o.dtype)

    # ---- frames / actions: per-batch rows starting at lens_lang[b] -----------
    # Small static batch -> unrolled loop; one dynamic sublane slice per batch,
    # shared by frames and actions (same start position).
    for b in range(batch):
        off = off_ref[b]
        win = emb_ref[pl.ds(off, t_max), :]              # (T_max, D) from VMEM table
        frames_o[b] = (frames_ref[b] + win[:t_frames]).astype(frames_o.dtype)
        actions_o[b] = (actions_ref[b] + win[:t_actions]).astype(actions_o.dtype)


def pos_learned_encoding(lang, frames, actions, lens_lang, emb_table):
    """JAX/Pallas equivalent of PosLearnedEncoding.forward (lens_frames unused, as in torch)."""
    B, T_lang, D = lang.shape
    _, T_frames, _ = frames.shape
    _, T_actions, _ = actions.shape
    max_pos, Dt = emb_table.shape
    assert D == Dt
    T_max = max(T_frames, T_actions)
    assert T_lang <= max_pos and T_max <= max_pos

    # Small-table fast path only: stage the whole table in VMEM.
    table_bytes = emb_table.size * emb_table.dtype.itemsize
    if table_bytes > 8 * 1024 * 1024:
        # TODO(synk): HBM + async-copy windowed path for large embedding tables.
        raise NotImplementedError("embedding table too large for the VMEM-resident path")

    # Clamp row offsets so the in-kernel slice can never run past the table
    # (no effect for valid inputs; see NOTE at top about torch raising instead).
    offs = jnp.clip(lens_lang.astype(jnp.int32), 0, max_pos - T_max)

    kernel = functools.partial(
        _pos_enc_kernel,
        batch=B, t_lang=T_lang, t_frames=T_frames, t_actions=T_actions, t_max=T_max)

    return pl.pallas_call(
        kernel,
        out_shape=(
            jax.ShapeDtypeStruct((B, T_lang, D), lang.dtype),
            jax.ShapeDtypeStruct((B, T_frames, D), frames.dtype),
            jax.ShapeDtypeStruct((B, T_actions, D), actions.dtype),
        ),
        grid_spec=pltpu.PrefetchScalarGridSpec(
            num_scalar_prefetch=1,                     # offsets -> SMEM
            grid=(1,),                                 # single fused step (see header TODO for v7x)
            in_specs=[
                pl.BlockSpec((B, T_lang, D), lambda i, offs: (0, 0, 0)),
                pl.BlockSpec((B, T_frames, D), lambda i, offs: (0, 0, 0)),
                pl.BlockSpec((B, T_actions, D), lambda i, offs: (0, 0, 0)),
                pl.BlockSpec((max_pos, D), lambda i, offs: (0, 0)),   # table -> VMEM
            ],
            out_specs=[
                pl.BlockSpec((B, T_lang, D), lambda i, offs: (0, 0, 0)),
                pl.BlockSpec((B, T_frames, D), lambda i, offs: (0, 0, 0)),
                pl.BlockSpec((B, T_actions, D), lambda i, offs: (0, 0, 0)),
            ],
        ),
        compiler_params=pltpu.CompilerParams(
            dimension_semantics=("arbitrary",),
        ),
    )(offs, lang, frames, actions, emb_table)


if __name__ == "__main__":
    d_model = 32
    max_pos = 1250
    init_range = 0.1
    B = 2
    T_lang = 8
    T_frames = 12
    T_actions = 12

    key = jax.random.PRNGKey(0)
    k_emb, k_lang, k_frames, k_actions = jax.random.split(key, 4)

    # Deterministic init matching nn.Embedding(max_pos, d_model).uniform_(-0.1, 0.1)
    emb_table = jax.random.uniform(
        k_emb, (max_pos, d_model), dtype=jnp.float32,
        minval=-init_range, maxval=init_range)

    lang = jax.random.normal(k_lang, (B, T_lang, d_model), dtype=jnp.float32)
    frames = jax.random.normal(k_frames, (B, T_frames, d_model), dtype=jnp.float32)
    actions = jax.random.normal(k_actions, (B, T_actions, d_model), dtype=jnp.float32)
    lens_lang = jnp.array([5, 8], dtype=jnp.int32)                   # per-batch language lengths
    lens_frames = jnp.array([T_frames, T_frames], dtype=jnp.int32)   # unused (matches torch)

    lang_o, frames_o, actions_o = pos_learned_encoding(
        lang, frames, actions, lens_lang, emb_table)
    jax.block_until_ready((lang_o, frames_o, actions_o))

    # Pure-JAX reference check
    pos_lang = jnp.broadcast_to(jnp.arange(T_lang), (B, T_lang))
    pos_frames = jnp.arange(T_frames)[None, :] + lens_lang[:, None]
    pos_actions = jnp.arange(T_actions)[None, :] + lens_lang[:, None]
    ref_lang = lang + emb_table[pos_lang]
    ref_frames = frames + emb_table[pos_frames]
    ref_actions = actions + emb_table[pos_actions]

    assert jnp.allclose(lang_o, ref_lang, atol=1e-6)
    assert jnp.allclose(frames_o, ref_frames, atol=1e-6)
    assert jnp.allclose(actions_o, ref_actions, atol=1e-6)

    print("KERNEL_OK")
</pallas_src>

<mosaic_0001>
module attributes {stable_mosaic.version = 11 : i64} {
  func.func @_pos_enc_kernel(%arg0: i32, %arg1: memref<2xi32, #tpu.memory_space<smem>>, %arg2: memref<2x8x32xf32, #tpu.memory_space<vmem>>, %arg3: memref<2x12x32xf32, #tpu.memory_space<vmem>>, %arg4: memref<2x12x32xf32, #tpu.memory_space<vmem>>, %arg5: memref<1250x32xf32, #tpu.memory_space<vmem>>, %arg6: memref<2x8x32xf32, #tpu.memory_space<vmem>>, %arg7: memref<2x12x32xf32, #tpu.memory_space<vmem>>, %arg8: memref<2x12x32xf32, #tpu.memory_space<vmem>>) attributes {dimension_semantics = [#tpu.dimension_semantics<arbitrary>], iteration_bounds = array<i64: 1>, scalar_prefetch = 1 : i64, scratch_operands = 0 : i64, tpu.core_type = #tpu.core_type<tc>, window_params = [{pipeline_mode = #tpu.pipeline_mode<synchronous>, transform_indices = @transform_0, window_bounds = array<i64: 2, 8, 32>}, {pipeline_mode = #tpu.pipeline_mode<synchronous>, transform_indices = @transform_1, window_bounds = array<i64: 2, 12, 32>}, {pipeline_mode = #tpu.pipeline_mode<synchronous>, transform_indices = @transform_2, window_bounds = array<i64: 2, 12, 32>}, {pipeline_mode = #tpu.pipeline_mode<synchronous>, transform_indices = @transform_3, window_bounds = array<i64: 1250, 32>}, {pipeline_mode = #tpu.pipeline_mode<synchronous>, transform_indices = @transform_4, window_bounds = array<i64: 2, 8, 32>}, {pipeline_mode = #tpu.pipeline_mode<synchronous>, transform_indices = @transform_5, window_bounds = array<i64: 2, 12, 32>}, {pipeline_mode = #tpu.pipeline_mode<synchronous>, transform_indices = @transform_6, window_bounds = array<i64: 2, 12, 32>}]} {
    %c0 = arith.constant 0 : index
    %c0_0 = arith.constant 0 : index
    %0 = vector.load %arg5[%c0, %c0_0] : memref<1250x32xf32, #tpu.memory_space<vmem>>, vector<8x32xf32>
    %c0_1 = arith.constant 0 : index
    %c0_2 = arith.constant 0 : index
    %c0_3 = arith.constant 0 : index
    %1 = vector.load %arg2[%c0_1, %c0_2, %c0_3] : memref<2x8x32xf32, #tpu.memory_space<vmem>>, vector<2x8x32xf32>
    %2 = vector.shape_cast %0 : vector<8x32xf32> to vector<1x8x32xf32>
    %3 = vector.broadcast %2 : vector<1x8x32xf32> to vector<2x8x32xf32>
    %4 = arith.addf %1, %3 : vector<2x8x32xf32>
    %c0_4 = arith.constant 0 : index
    %c0_5 = arith.constant 0 : index
    %c0_6 = arith.constant 0 : index
    %5 = vector.load %arg6[%c0_4, %c0_5, %c0_6] : memref<2x8x32xf32, #tpu.memory_space<vmem>>, vector<2x8x32xf32>
    tpu.vector_store %arg6[%c0_4, %c0_5, %c0_6], %4 {strides = array<i32>} : memref<2x8x32xf32, #tpu.memory_space<vmem>>, vector<2x8x32xf32>,
    %c0_7 = arith.constant 0 : index
    %6 = memref.load %arg1[%c0_7] : memref<2xi32, #tpu.memory_space<smem>>
    %7 = arith.index_cast %6 : i32 to index
    %c0_8 = arith.constant 0 : index
    %8 = vector.load %arg5[%7, %c0_8] : memref<1250x32xf32, #tpu.memory_space<vmem>>, vector<12x32xf32>
    %c0_9 = arith.constant 0 : index
    %c0_10 = arith.constant 0 : index
    %c0_11 = arith.constant 0 : index
    %9 = vector.load %arg3[%c0_9, %c0_10, %c0_11] : memref<2x12x32xf32, #tpu.memory_space<vmem>>, vector<1x12x32xf32>
    %10 = vector.shape_cast %9 : vector<1x12x32xf32> to vector<12x32xf32>
    %11 = arith.addf %10, %8 : vector<12x32xf32>
    %c0_12 = arith.constant 0 : index
    %c0_13 = arith.constant 0 : index
    %c0_14 = arith.constant 0 : index
    %12 = vector.load %arg7[%c0_12, %c0_13, %c0_14] : memref<2x12x32xf32, #tpu.memory_space<vmem>>, vector<1x12x32xf32>
    %13 = vector.shape_cast %12 : vector<1x12x32xf32> to vector<12x32xf32>
    %14 = vector.shape_cast %11 : vector<12x32xf32> to vector<1x12x32xf32>
    tpu.vector_store %arg7[%c0_12, %c0_13, %c0_14], %14 {strides = array<i32>} : memref<2x12x32xf32, #tpu.memory_space<vmem>>, vector<1x12x32xf32>,
    %c0_15 = arith.constant 0 : index
    %c0_16 = arith.constant 0 : index
    %c0_17 = arith.constant 0 : index
    %15 = vector.load %arg4[%c0_15, %c0_16, %c0_17] : memref<2x12x32xf32, #tpu.memory_space<vmem>>, vector<1x12x32xf32>
    %16 = vector.shape_cast %15 : vector<1x12x32xf32> to vector<12x32xf32>
    %17 = arith.addf %16, %8 : vector<12x32xf32>
    %c0_18 = arith.constant 0 : index
    %c0_19 = arith.constant 0 : index
    %c0_20 = arith.constant 0 : index
    %18 = vector.load %arg8[%c0_18, %c0_19, %c0_20] : memref<2x12x32xf32, #tpu.memory_space<vmem>>, vector<1x12x32xf32>
    %19 = vector.shape_cast %18 : vector<1x12x32xf32> to vector<12x32xf32>
    %20 = vector.shape_cast %17 : vector<12x32xf32> to vector<1x12x32xf32>
    tpu.vector_store %arg8[%c0_18, %c0_19, %c0_20], %20 {strides = array<i32>} : memref<2x12x32xf32, #tpu.memory_space<vmem>>, vector<1x12x32xf32>,
    %c1 = arith.constant 1 : index
    %21 = memref.load %arg1[%c1] : memref<2xi32, #tpu.memory_space<smem>>
    %22 = arith.index_cast %21 : i32 to index
    %c0_21 = arith.constant 0 : index
    %23 = vector.load %arg5[%22, %c0_21] : memref<1250x32xf32, #tpu.memory_space<vmem>>, vector<12x32xf32>
    %c1_22 = arith.constant 1 : index
    %c0_23 = arith.constant 0 : index
    %c0_24 = arith.constant 0 : index
    %24 = vector.load %arg3[%c1_22, %c0_23, %c0_24] : memref<2x12x32xf32, #tpu.memory_space<vmem>>, vector<1x12x32xf32>
    %25 = vector.shape_cast %24 : vector<1x12x32xf32> to vector<12x32xf32>
    %26 = arith.addf %25, %23 : vector<12x32xf32>
    %c1_25 = arith.constant 1 : index
    %c0_26 = arith.constant 0 : index
    %c0_27 = arith.constant 0 : index
    %27 = vector.load %arg7[%c1_25, %c0_26, %c0_27] : memref<2x12x32xf32, #tpu.memory_space<vmem>>, vector<1x12x32xf32>
    %28 = vector.shape_cast %27 : vector<1x12x32xf32> to vector<12x32xf32>
    %29 = vector.shape_cast %26 : vector<12x32xf32> to vector<1x12x32xf32>
    tpu.vector_store %arg7[%c1_25, %c0_26, %c0_27], %29 {strides = array<i32>} : memref<2x12x32xf32, #tpu.memory_space<vmem>>, vector<1x12x32xf32>,
    %c1_28 = arith.constant 1 : index
    %c0_29 = arith.constant 0 : index
    %c0_30 = arith.constant 0 : index
    %30 = vector.load %arg4[%c1_28, %c0_29, %c0_30] : memref<2x12x32xf32, #tpu.memory_space<vmem>>, vector<1x12x32xf32>
    %31 = vector.shape_cast %30 : vector<1x12x32xf32> to vector<12x32xf32>
    %32 = arith.addf %31, %23 : vector<12x32xf32>
    %c1_31 = arith.constant 1 : index
    %c0_32 = arith.constant 0 : index
    %c0_33 = arith.constant 0 : index
    %33 = vector.load %arg8[%c1_31, %c0_32, %c0_33] : memref<2x12x32xf32, #tpu.memory_space<vmem>>, vector<1x12x32xf32>
    %34 = vector.shape_cast %33 : vector<1x12x32xf32> to vector<12x32xf32>
    %35 = vector.shape_cast %32 : vector<12x32xf32> to vector<1x12x32xf32>
    tpu.vector_store %arg8[%c1_31, %c0_32, %c0_33], %35 {strides = array<i32>} : memref<2x12x32xf32, #tpu.memory_space<vmem>>, vector<1x12x32xf32>,
    return
  }
  func.func @transform_0(%arg0: i32, %arg1: memref<2xi32, #tpu.memory_space<smem>>) -> (i32, i32, i32) {
    %c0_i32 = arith.constant 0 : i32
    %c0_i32_0 = arith.constant 0 : i32
    %c0_i32_1 = arith.constant 0 : i32
    %c0_i32_2 = arith.constant 0 : i32
    return %c0_i32, %c0_i32_0, %c0_i32_1 : i32, i32, i32
  }
  func.func @transform_1(%arg0: i32, %arg1: memref<2xi32, #tpu.memory_space<smem>>) -> (i32, i32, i32) {
    %c0_i32 = arith.constant 0 : i32
    %c0_i32_0 = arith.constant 0 : i32
    %c0_i32_1 = arith.constant 0 : i32
    %c0_i32_2 = arith.constant 0 : i32
    return %c0_i32, %c0_i32_0, %c0_i32_1 : i32, i32, i32
  }
  func.func @transform_2(%arg0: i32, %arg1: memref<2xi32, #tpu.memory_space<smem>>) -> (i32, i32, i32) {
    %c0_i32 = arith.constant 0 : i32
    %c0_i32_0 = arith.constant 0 : i32
    %c0_i32_1 = arith.constant 0 : i32
    %c0_i32_2 = arith.constant 0 : i32
    return %c0_i32, %c0_i32_0, %c0_i32_1 : i32, i32, i32
  }
  func.func @transform_3(%arg0: i32, %arg1: memref<2xi32, #tpu.memory_space<smem>>) -> (i32, i32) {
    %c0_i32 = arith.constant 0 : i32
    %c0_i32_0 = arith.constant 0 : i32
    %c0_i32_1 = arith.constant 0 : i32
    return %c0_i32, %c0_i32_0 : i32, i32
  }
  func.func @transform_4(%arg0: i32, %arg1: memref<2xi32, #tpu.memory_space<smem>>) -> (i32, i32, i32) {
    %c0_i32 = arith.constant 0 : i32
    %c0_i32_0 = arith.constant 0 : i32
    %c0_i32_1 = arith.constant 0 : i32
    %c0_i32_2 = arith.constant 0 : i32
    return %c0_i32, %c0_i32_0, %c0_i32_1 : i32, i32, i32
  }
  func.func @transform_5(%arg0: i32, %arg1: memref<2xi32, #tpu.memory_space<smem>>) -> (i32, i32, i32) {
    %c0_i32 = arith.constant 0 : i32
    %c0_i32_0 = arith.constant 0 : i32
    %c0_i32_1 = arith.constant 0 : i32
    %c0_i32_2 = arith.constant 0 : i32
    return %c0_i32, %c0_i32_0, %c0_i32_1 : i32, i32, i32
  }
  func.func @transform_6(%arg0: i32, %arg1: memref<2xi32, #tpu.memory_space<smem>>) -> (i32, i32, i32) {
    %c0_i32 = arith.constant 0 : i32
    %c0_i32_0 = arith.constant 0 : i32
    %c0_i32_1 = arith.constant 0 : i32
    %c0_i32_2 = arith.constant 0 : i32
    return %c0_i32, %c0_i32_0, %c0_i32_1 : i32, i32, i32
  }
}

</mosaic_0001>

<bundles_post_ra>
// kernel: tpu_custom_call.1
= control target key start
LH: loop header
LB: loop body
LE: loop exit
PB: predicated region body
PF: predicated region fallthrough
CT: control target
= control target key end

     0   :  { %s289_s0 = inlined_call_operand.vmem [shape: s32[2], index: 0, kind: input, shape index: {}]   ;;  %s290_s1 = inlined_call_operand.vmem [shape: f32[2,8,32], index: 1, kind: input, shape index: {}]   ;;  %s291_s2 = inlined_call_operand.vmem [shape: f32[2,12,32], index: 2, kind: input, shape index: {}]   ;;  %s292_s3 = inlined_call_operand.vmem [shape: f32[2,12,32], index: 3, kind: input, shape index: {}]   ;;  %s293_s4 = inlined_call_operand.vmem [shape: f32[1250,32], index: 4, kind: input, shape index: {}]   ;;  %s294_s5 = inlined_call_operand.hbm [shape: f32[2,8,32], index: 5, kind: output, shape index: {0}]   ;;  %s295_s6 = inlined_call_operand.vmem [shape: f32[2,12,32], index: 6, kind: output, shape index: {1}]   ;;  %s296_s7 = inlined_call_operand.vmem [shape: f32[2,12,32], index: 7, kind: output, shape index: {2}]  }
   0x1   :  { %s13_s26 = sshll.u32 %s289_s0, 4  ;;  %s14_s26 = int_to_ptr.vmem [resolvable:$true] %s13_s26 }
   0x2   :  { %s112_s27 = scalar_lea.vmem %s14_s26, 16  ;;  %p117_p1 = scmp.lt.s32.totalorder %s14_s26, %s14_s26 }
   0x3   :  { %p113_p0 = scmp.ne.s32.totalorder %s14_s26, %s112_s27  ;;  %p118_p2 = scmp.lt.s32.totalorder %s112_s27, %s112_s27 }
   0x5   :  { %p119_p3 = por %p118_p2, %p117_p1 }
   0x7   :  { %p120_p4 = pnand %p119_p3, %p113_p0 }
   0x9   :  { %123 = shalt.err (!%p120_p4)  }
   0xa   :  { %s150_s28 = smov [#allocation3]  }
   0xb   :  { %16 = dma.vmem_to_smem %s14_s26, 16, %s150_s28, [#allocation2] }
   0xc   :  { %146 = dma.done.wait [#allocation2], 16 }
   0xd   :  { %147 = vsyncadd [#allocation2], 4294967280 }
   0xe   :  { %18 = sfence }
   0xf   :  { %v28_v0 = vld [vmem:[%s293_s4] sm:$0xff]  ;;  %vm33_vm0 = vcmask 261120   ;;  %v30_v2 = vld [vmem:[%s290_s1 + $0x8] sm:$0xff]  ;;  %s36_s11 = sld [smem:[#allocation3]]  ;;  %s99_s12 = sld [smem:[#allocation3 + $0x1]] }
  0x10   :  { %v29_v1 = vld [vmem:[%s290_s1] sm:$0xff]  ;;  %v32_v4 = vadd.f32 %v30_v2, %v28_v0 }
  0x11   :  { %v31_v3 = vadd.f32 %v29_v1, %v28_v0 }
  0x12   :  { %35 = vst.msk [vmem:[#allocation4 + $0x8] sm:$0xff] %vm33_vm0, %v32_v4 }
  0x13   :  { %34 = vst.msk [vmem:[#allocation4] sm:$0xff] %vm33_vm0, %v31_v3 }
  0x14   :  { %19 = vsyncpa [#allocation5], 0  ;;  %v40_v5 = vld [vmem:[%s291_s2] sm:$0xff]  ;;  %s151_s15 = smov [#allocation4]   ;;  %v41_v6 = vld [vmem:[%s291_s2 + $0x8] sm:$0xf] }
  0x15   :  { %s78_s16 = sshll.u32 %s151_s15, 4  ;;  %v47_v7 = vld [vmem:[%s292_s3] sm:$0xff]  ;;  %v48_v8 = vld [vmem:[%s292_s3 + $0x8] sm:$0xf]  ;;  %s37_s24 = scalar_lea.vmem %s293_s4, %s36_s11  ;;  %vm45_vm1 = vcmask 257024   ;;  %v100_v9 = vld [vmem:[%s291_s2 + $0x10] sm:$0xff]  ;;  %s235_s16 = int_to_ptr.vmem [resolvable:$true] %s78_s16 }
  0x16   :  { %v101_v10 = vld [vmem:[%s291_s2 + $0x18] sm:$0xf]  ;;  %v104_v11 = vld [vmem:[%s292_s3 + $0x10] sm:$0xff]  ;;  %v38_v12 = vld [vmem:[%s37_s24] sm:$0xff]  ;;  %s54_s10 = scalar_lea.vmem %s293_s4, %s99_s12  ;;  %s124_s12 = scalar_lea.vmem %s235_s16, 256 }
  0x17   :  { %v39_v13 = vld [vmem:[%s37_s24 + $0x8] sm:$0xf]  ;;  %v105_v14 = vld [vmem:[%s292_s3 + $0x18] sm:$0xf]  ;;  %v42_v15 = vadd.f32 %v40_v5, %v38_v12  ;;  %v49_v17 = vadd.f32 %v47_v7, %v38_v12  ;;  %v55_v19 = vld [vmem:[%s54_s10] sm:$0xff]  ;;  %p125_p5 = scmp.ne.s32.totalorder %s235_s16, %s124_s12  ;;  %p129_p6 = scmp.lt.s32.totalorder %s235_s16, %s235_s16 }
  0x18   :  { %v43_v16 = vadd.f32 %v41_v6, %v39_v13  ;;  %v50_v18 = vadd.f32 %v48_v8, %v39_v13  ;;  %v56_v20 = vld [vmem:[%s54_s10 + $0x8] sm:$0xf]  ;;  %v60_v21 = vadd.f32 %v100_v9, %v55_v19  ;;  %v68_v23 = vadd.f32 %v104_v11, %v55_v19  ;;  %p130_p7 = scmp.lt.s32.totalorder %s124_s12, %s124_s12 }
  0x19   :  { %44 = vst.msk [vmem:[%s295_s6] sm:$0xff] %vm33_vm0, %v42_v15  ;;  %51 = vst.msk [vmem:[%s296_s7] sm:$0xff] %vm33_vm0, %v49_v17  ;;  %v61_v22 = vadd.f32 %v101_v10, %v56_v20  ;;  %v69_v24 = vadd.f32 %v105_v14, %v56_v20 }
  0x1a   :  { %46 = vst.msk [vmem:[%s295_s6 + $0x8] sm:$0xf] %vm45_vm1, %v43_v16  ;;  %52 = vst.msk [vmem:[%s296_s7 + $0x8] sm:$0xf] %vm45_vm1, %v50_v18  ;;  %p131_p8 = por %p130_p7, %p129_p6 }
  0x1c   :  { %p132_p9 = pnand %p131_p8, %p125_p5 }
  0x1e   :  { %135 = shalt.err (!%p132_p9)
}
  0x1f   :  { %s136_s20 = scalar_lea.hbm %s294_s5, 256 }
  0x20   :  { %p137_p10 = scmp.ne.s32.totalorder %s294_s5, %s136_s20  ;;  %p140_p11 = scmp.lt.u32.totalorder %s136_s20, %s294_s5 }
  0x22   :  { %p142_p12 = pnand %p140_p11, %p137_p10 }
  0x24   :  { %145 = shalt.err (!%p142_p12)
}
  0x25   :  { %s152_s25 = smov 128   ;;  %s153_s26 = smov 8   ;;  %102 = vst.msk [vmem:[%s295_s6 + $0x10] sm:$0xff] %vm33_vm0, %v60_v21  ;;  %106 = vst.msk [vmem:[%s296_s7 + $0x10] sm:$0xff] %vm33_vm0, %v68_v23 }
  0x26   :  { %84 = dma.vmem_to_hbm [thread:$0]  %s235_s16, 256, %s294_s5, [#allocation5], %s152_s25, %s152_s25, %s153_s26  }
  0x27   :  { %103 = vst.msk [vmem:[%s295_s6 + $0x18] sm:$0xf] %vm45_vm1, %v61_v22  ;;  %107 = vst.msk [vmem:[%s296_s7 + $0x18] sm:$0xf] %vm45_vm1, %v69_v24 }
  0x28   :  { %148 = dma.done.wait [#allocation5], 256  }
  0x29   :  { %149 = vsyncadd [#allocation5], 4294967040 }
  0x2a   :  { %96 = vsyncpa [#allocation5], 1 }

</bundles_post_ra>
